<compile_context>
chip_gen: v7x
topology: tpu7x:2x2x1
jax: 0.10.0
libtpu: 0.0.40
codegen_flags: <defaults>
</compile_context>

<pallas_src>
import jax
import jax.numpy as jnp
from jax import lax
from jax.experimental import pallas as pl
from jax.experimental.pallas import tpu as pltpu


def _round_up(x, m):
    return ((x + m - 1) // m) * m


def unit_embedding_kernel(utype_ref, ufeat_ref, table_ref, w_ref, b_ref, out_ref):
    tm = utype_ref.shape[0]
    num_utype, emb_dim = table_ref.shape

    # --- embedding lookup as one-hot matmul on the MXU ---
    utype = utype_ref[...]                                        # (tm, 1) int32
    iota = lax.broadcasted_iota(jnp.int32, (tm, num_utype), 1)    # (tm, num_utype)
    onehot = (utype == iota).astype(table_ref.dtype)
    utype_emb = jnp.dot(onehot, table_ref[...],
                        preferred_element_type=jnp.float32)       # (tm, emb_dim) f32

    # --- linear with pre-scaled, pre-transposed weight-norm weight ---
    # w_ref is already (num_ufeat, emb_dim) and already multiplied by g/||V||_F.
    ufeat_emb = jnp.dot(ufeat_ref[...], w_ref[...],
                        preferred_element_type=jnp.float32) + b_ref[...]

    # --- single lane-dense store of the whole output row ---
    out_ref[...] = jnp.concatenate([utype_emb, ufeat_emb], axis=-1).astype(out_ref.dtype)


def unit_embedding(utype, ufeat, table, v, g, b, *,
                   compute_dtype=jnp.float32, tm_target=512):
    """utype: [B, U] int, ufeat: [B, U, F] f32 -> [B, U, 2*emb_dim] f32.

    compute_dtype controls the matmul operand dtype (f32 or bf16); accumulation
    is always f32.
    """
    B, U = utype.shape
    F = ufeat.shape[-1]
    num_utype, emb_dim = table.shape
    rows = B * U

    # ---- wrapper-side parameter prep (pure layout plumbing / scalar math) ----
    # weight_norm(dim=None): W = g * V / ||V||_F. Hoisted out of the kernel and
    # pre-transposed to (F, emb_dim) so tiles do no XLU work.
    v_f32 = v.astype(jnp.float32)
    scale = g.astype(jnp.float32) / jnp.sqrt(jnp.sum(v_f32 * v_f32))
    w_t = (v_f32 * scale).T.astype(compute_dtype)                 # (F, emb_dim)
    table_c = table.astype(compute_dtype)                         # (num_utype, emb_dim)
    b2d = b.reshape(1, emb_dim).astype(jnp.float32)

    utype2d = utype.reshape(rows, 1).astype(jnp.int32)
    ufeat2d = ufeat.reshape(rows, F).astype(compute_dtype)

    # ---- row tiling: pad rows to a multiple of the tile size ----
    tm = min(tm_target, _round_up(rows, 8))
    rows_p = _round_up(rows, tm)
    if rows_p != rows:
        utype2d = jnp.pad(utype2d, ((0, rows_p - rows), (0, 0)))
        ufeat2d = jnp.pad(ufeat2d, ((0, rows_p - rows), (0, 0)))
    grid = (rows_p // tm,)

    itemsize = jnp.dtype(compute_dtype).itemsize
    cost = pl.CostEstimate(
        flops=2 * rows_p * emb_dim * (num_utype + F),
        transcendentals=0,
        bytes_accessed=(rows_p * (4 + F * itemsize + 2 * emb_dim * 4)
                        + (num_utype + F) * emb_dim * itemsize
                        + emb_dim * 4),
    )

    out = pl.pallas_call(
        unit_embedding_kernel,
        out_shape=jax.ShapeDtypeStruct((rows_p, 2 * emb_dim), jnp.float32),
        grid=grid,
        in_specs=[
            pl.BlockSpec((tm, 1), lambda i: (i, 0)),              # utype (row-tiled)
            pl.BlockSpec((tm, F), lambda i: (i, 0)),              # ufeat (row-tiled)
            pl.BlockSpec((num_utype, emb_dim), lambda i: (0, 0)),  # table (resident)
            pl.BlockSpec((F, emb_dim), lambda i: (0, 0)),          # scaled W^T (resident)
            pl.BlockSpec((1, emb_dim), lambda i: (0, 0)),          # bias (resident)
        ],
        out_specs=pl.BlockSpec((tm, 2 * emb_dim), lambda i: (i, 0)),
        compiler_params=pltpu.CompilerParams(
            dimension_semantics=("parallel",),          # megacore split on v7x
            vmem_limit_bytes=32 * 1024 * 1024,          # fits v7x's 64 MiB VMEM
        ),
        cost_estimate=cost,
    )(utype2d, ufeat2d, table_c, w_t, b2d)

    return out[:rows].reshape(B, U, 2 * emb_dim)


def unit_embedding_ref(utype, ufeat, table, v, g, b):
    """Pure-JAX reference matching the PyTorch module semantics (f32)."""
    utype_emb = table[utype]                                    # [B, U, emb_dim]
    w_eff = v * (g / jnp.sqrt(jnp.sum(v * v)))                  # [emb_dim, F]
    ufeat_emb = jnp.einsum("buf,ef->bue", ufeat, w_eff) + b     # [B, U, emb_dim]
    return jnp.concatenate([utype_emb, ufeat_emb], axis=2)


if __name__ == "__main__":
    # Small, deterministic setup.
    num_utype, num_ufeat, emb_dim = 16, 10, 32
    B, U = 2, 8

    key = jax.random.PRNGKey(0)
    k_tab, k_v, k_b, k_utype, k_ufeat = jax.random.split(key, 5)

    # Parameters (deterministic synthetic init).
    table = jax.random.normal(k_tab, (num_utype, emb_dim), dtype=jnp.float32)
    v = jax.random.normal(k_v, (emb_dim, num_ufeat), dtype=jnp.float32) * 0.1
    g = jnp.sqrt(jnp.sum(v * v))   # weight_norm init: g = ||V||_F so W == V at init
    b = jax.random.normal(k_b, (emb_dim,), dtype=jnp.float32) * 0.01

    # Inputs.
    utype = jax.random.randint(k_utype, (B, U), 0, num_utype, dtype=jnp.int32)
    ufeat = jax.random.normal(k_ufeat, (B, U, num_ufeat), dtype=jnp.float32)

    ref = unit_embedding_ref(utype, ufeat, table, v, g, b)

    # f32 path: matches the PyTorch module numerics.
    out = jax.block_until_ready(unit_embedding(utype, ufeat, table, v, g, b))
    assert out.shape == (B, U, 2 * emb_dim), out.shape
    assert jnp.allclose(out, ref, atol=1e-5, rtol=1e-5), \
        float(jnp.max(jnp.abs(out - ref)))

    # bf16-operand / f32-accumulate path (halves ufeat/table/weight HBM bytes
    # on this memory-bound op; looser tolerance reflects bf16 operand rounding).
    out_bf16 = jax.block_until_ready(
        unit_embedding(utype, ufeat, table, v, g, b, compute_dtype=jnp.bfloat16))
    assert jnp.allclose(out_bf16, ref, atol=3e-2, rtol=3e-2), \
        float(jnp.max(jnp.abs(out_bf16 - ref)))

    print("KERNEL_OK")
</pallas_src>

<mosaic_0001>
module attributes {stable_mosaic.version = 11 : i64} {
  func.func @unit_embedding_kernel(%arg0: i32, %arg1: memref<16x1xi32, #tpu.memory_space<vmem>>, %arg2: memref<16x10xf32, #tpu.memory_space<vmem>>, %arg3: memref<16x32xf32, #tpu.memory_space<vmem>>, %arg4: memref<10x32xf32, #tpu.memory_space<vmem>>, %arg5: memref<1x32xf32, #tpu.memory_space<vmem>>, %arg6: memref<16x64xf32, #tpu.memory_space<vmem>>) attributes {dimension_semantics = [#tpu.dimension_semantics<parallel>], iteration_bounds = array<i64: 1>, scalar_prefetch = 0 : i64, scratch_operands = 0 : i64, tpu.core_type = #tpu.core_type<tc>, window_params = [{transform_indices = @transform_0, window_bounds = array<i64: 16, 1>}, {transform_indices = @transform_1, window_bounds = array<i64: 16, 10>}, {pipeline_mode = #tpu.pipeline_mode<synchronous>, transform_indices = @transform_2, window_bounds = array<i64: 16, 32>}, {pipeline_mode = #tpu.pipeline_mode<synchronous>, transform_indices = @transform_3, window_bounds = array<i64: 10, 32>}, {pipeline_mode = #tpu.pipeline_mode<synchronous>, transform_indices = @transform_4, window_bounds = array<i64: 1, 32>}, {transform_indices = @transform_5, window_bounds = array<i64: 16, 64>}]} {
    %c0 = arith.constant 0 : index
    %c0_0 = arith.constant 0 : index
    %0 = vector.load %arg1[%c0, %c0_0] : memref<16x1xi32, #tpu.memory_space<vmem>>, vector<16x1xi32>
    %1 = tpu.iota {dimensions = array<i32: 1>} : vector<16x16xi32>
    %2 = vector.broadcast %0 : vector<16x1xi32> to vector<16x16xi32>
    %3 = arith.cmpi eq, %2, %1 : vector<16x16xi32>
    %4 = arith.extui %3 : vector<16x16xi1> to vector<16x16xi32>
    %5 = arith.sitofp %4 : vector<16x16xi32> to vector<16x16xf32>
    %c0_1 = arith.constant 0 : index
    %c0_2 = arith.constant 0 : index
    %6 = vector.load %arg3[%c0_1, %c0_2] : memref<16x32xf32, #tpu.memory_space<vmem>>, vector<16x32xf32>
    %cst = arith.constant dense<0.000000e+00> : vector<16x32xf32>
    %7 = tpu.matmul %5, %6, %cst {dimension_numbers = #tpu.dot_dimension_numbers<[1], [0], [0], [1], [0, 0, 1, 1], [], []>} : vector<16x16xf32>, vector<16x32xf32>, vector<16x32xf32> -> vector<16x32xf32>
    %c0_3 = arith.constant 0 : index
    %c0_4 = arith.constant 0 : index
    %8 = vector.load %arg2[%c0_3, %c0_4] : memref<16x10xf32, #tpu.memory_space<vmem>>, vector<16x10xf32>
    %c0_5 = arith.constant 0 : index
    %c0_6 = arith.constant 0 : index
    %9 = vector.load %arg4[%c0_5, %c0_6] : memref<10x32xf32, #tpu.memory_space<vmem>>, vector<10x32xf32>
    %cst_7 = arith.constant dense<0.000000e+00> : vector<16x32xf32>
    %10 = tpu.matmul %8, %9, %cst_7 {dimension_numbers = #tpu.dot_dimension_numbers<[1], [0], [0], [1], [0, 0, 1, 1], [], []>} : vector<16x10xf32>, vector<10x32xf32>, vector<16x32xf32> -> vector<16x32xf32>
    %c0_8 = arith.constant 0 : index
    %c0_9 = arith.constant 0 : index
    %11 = vector.load %arg5[%c0_8, %c0_9] : memref<1x32xf32, #tpu.memory_space<vmem>>, vector<1x32xf32>
    %12 = vector.broadcast %11 : vector<1x32xf32> to vector<16x32xf32>
    %13 = arith.addf %10, %12 : vector<16x32xf32>
    %14 = tpu.concatenate %7, %13 in 1 : vector<16x32xf32>, vector<16x32xf32> -> vector<16x64xf32>
    %c0_10 = arith.constant 0 : index
    %c0_11 = arith.constant 0 : index
    %15 = vector.load %arg6[%c0_10, %c0_11] : memref<16x64xf32, #tpu.memory_space<vmem>>, vector<16x64xf32>
    tpu.vector_store %arg6[%c0_10, %c0_11], %14 {strides = array<i32>} : memref<16x64xf32, #tpu.memory_space<vmem>>, vector<16x64xf32>,
    return
  }
  func.func @transform_0(%arg0: i32) -> (i32, i32) {
    %c0_i32 = arith.constant 0 : i32
    %c0_i32_0 = arith.constant 0 : i32
    return %arg0, %c0_i32 : i32, i32
  }
  func.func @transform_1(%arg0: i32) -> (i32, i32) {
    %c0_i32 = arith.constant 0 : i32
    %c0_i32_0 = arith.constant 0 : i32
    return %arg0, %c0_i32 : i32, i32
  }
  func.func @transform_2(%arg0: i32) -> (i32, i32) {
    %c0_i32 = arith.constant 0 : i32
    %c0_i32_0 = arith.constant 0 : i32
    %c0_i32_1 = arith.constant 0 : i32
    return %c0_i32, %c0_i32_0 : i32, i32
  }
  func.func @transform_3(%arg0: i32) -> (i32, i32) {
    %c0_i32 = arith.constant 0 : i32
    %c0_i32_0 = arith.constant 0 : i32
    %c0_i32_1 = arith.constant 0 : i32
    return %c0_i32, %c0_i32_0 : i32, i32
  }
  func.func @transform_4(%arg0: i32) -> (i32, i32) {
    %c0_i32 = arith.constant 0 : i32
    %c0_i32_0 = arith.constant 0 : i32
    %c0_i32_1 = arith.constant 0 : i32
    return %c0_i32, %c0_i32_0 : i32, i32
  }
  func.func @transform_5(%arg0: i32) -> (i32, i32) {
    %c0_i32 = arith.constant 0 : i32
    %c0_i32_0 = arith.constant 0 : i32
    return %arg0, %c0_i32 : i32, i32
  }
}

</mosaic_0001>

<bundles_post_ra>
// kernel: tpu_custom_call.1
= control target key start
LH: loop header
LB: loop body
LE: loop exit
PB: predicated region body
PF: predicated region fallthrough
CT: control target
= control target key end

     0   :  { %10 = vsyncpa [#allocation3], 0  ;;  %s501_s0 = inlined_call_operand.vmem [shape: s32[16,1], index: 0, kind: input, shape index: {}]   ;;  %s502_s1 = inlined_call_operand.vmem [shape: f32[16,10], index: 1, kind: input, shape index: {}]   ;;  %s503_s2 = inlined_call_operand.hbm [shape: f32[16,32], index: 2, kind: input, shape index: {}]   ;;  %s504_s3 = inlined_call_operand.hbm [shape: f32[10,32], index: 3, kind: input, shape index: {}]   ;;  %s505_s4 = inlined_call_operand.vmem [shape: f32[1,32], index: 4, kind: input, shape index: {}]   ;;  %s506_s5 = inlined_call_operand.hbm [shape: f32[16,64], index: 5, kind: output, shape index: {}]  }
   0x1   :  { %11 = vsyncpa [#allocation6], 0 }
   0x2   :  { %12 = vsyncpa [#allocation4], 0  ;;  %s400_s18 = smov [#allocation2]   ;;  %s328_s22 = scalar_lea.hbm %s503_s2, 256 }
   0x3   :  { %s22_s19 = sshll.u32 %s400_s18, 4  ;;  %p329_p0 = scmp.ne.s32.totalorder %s503_s2, %s328_s22  ;;  %s23_s19 = int_to_ptr.vmem [resolvable:$true] %s22_s19 }
   0x4   :  { %p332_p1 = scmp.lt.u32.totalorder %s328_s22, %s503_s2 }
   0x6   :  { %p334_p2 = pnand %p332_p1, %p329_p0 }
   0x8   :  { %337 = shalt.err (!%p334_p2)
}
   0x9   :  { %s338_s27 = scalar_lea.vmem %s23_s19, 256  ;;  %p343_p4 = scmp.lt.s32.totalorder %s23_s19, %s23_s19 }
   0xa   :  { %p339_p3 = scmp.ne.s32.totalorder %s23_s19, %s338_s27  ;;  %p344_p5 = scmp.lt.s32.totalorder %s338_s27, %s338_s27 }
   0xc   :  { %p345_p6 = por %p344_p5, %p343_p4 }
   0xe   :  { %p346_p7 = pnand %p345_p6, %p339_p3 }
  0x10   :  { %349 = shalt.err (!%p346_p7)
}
  0x11   :  { %s401_s28 = smov 128   ;;  %s402_s29 = smov 8  }
  0x12   :  { %28 = dma.hbm_to_vmem [thread:$0]  %s503_s2, 256, %s23_s19, [#allocation3], %s401_s28, %s401_s28, %s402_s29  }
  0x13   :  { %s403_s7 = smov [#allocation5]   ;;  %s350_s11 = scalar_lea.hbm %s504_s3, 256 }
  0x14   :  { %s34_s8 = sshll.u32 %s403_s7, 4  ;;  %p351_p8 = scmp.ne.s32.totalorder %s504_s3, %s350_s11  ;;  %s35_s8 = int_to_ptr.vmem [resolvable:$true] %s34_s8 }
  0x15   :  { %p354_p9 = scmp.lt.u32.totalorder %s350_s11, %s504_s3 }
  0x17   :  { %p356_p10 = pnand %p354_p9, %p351_p8 }
  0x19   :  { %359 = shalt.err (!%p356_p10)
}
  0x1a   :  { %s360_s16 = scalar_lea.vmem %s35_s8, 256  ;;  %p365_p12 = scmp.lt.s32.totalorder %s35_s8, %s35_s8 }
  0x1b   :  { %p361_p11 = scmp.ne.s32.totalorder %s35_s8, %s360_s16  ;;  %p366_p13 = scmp.lt.s32.totalorder %s360_s16, %s360_s16 }
  0x1d   :  { %p367_p0 = por %p366_p13, %p365_p12 }
  0x1f   :  { %p368_p1 = pnand %p367_p0, %p361_p11 }
  0x21   :  { %371 = shalt.err (!%p368_p1)
}
  0x22   :  { %40 = dma.hbm_to_vmem [thread:$0]  %s504_s3, 256, %s35_s8, [#allocation6], %s401_s28, %s401_s28, %s402_s29  }
  0x23   :  { %394 = dma.done.wait [#allocation3], 256  }
  0x24   :  { %395 = vsyncadd [#allocation3], 4294967040 }
  0x25   :  { %396 = dma.done.wait [#allocation6], 256  }
  0x26   :  { %397 = vsyncadd [#allocation6], 4294967040  ;;  %v404_v0 = vmov 0   ;;  %vm167_vm0 = vcmask 1041408   ;;  %vm405_vm1 = vmmov 1   ;;  %vm160_vm3 = vcmask 80896  }
  0x27   :  { %327 = vset.pattern.permute.xlu0 %v404_v0  ;;  %vm313_vm2 = vmpackc.low %vm167_vm0, %vm405_vm1  ;;  %v49_v1 = vld [vmem:[%s501_s0] sm:$0xff]  ;;  %v152_v3 = vld [vmem:[#allocation5 + $0x8] sm:$0x3]  ;;  %v51_v11 = vlaneseq  ;;  %vm67_vm4 = vcmask 130048   ;;  %v406_v14 = vmov 0.0   ;;  %vm254_vm7 = vcmask 261120  }
  0x28   :  { %v151_v2 = vld [vmem:[#allocation5] sm:$0xff]  ;;  %54 = vperm.xlu0 %327, %v49_v1   ;;  %v50_v6 = vld [vmem:[%s501_s0 + $0x8] sm:$0xff]  ;;  %v65_v7 = vld [vmem:[#allocation2] sm:$0xff]  ;;  %s408_s26 = smov [#allocation7]   ;;  %vm257_vm8 = vcmask 523264  }
  0x29   :  { %v312_v4 = vpack.c.bf16 %v152_v3, %v151_v2  ;;  %v149_v5 = vld [vmem:[%s502_s1] sm:$0xff]  ;;  %v66_v8 = vld [vmem:[#allocation2 + $0x8] sm:$0xff]  ;;  %v150_v10 = vld [vmem:[%s502_s1 + $0x8] sm:$0xff]  ;;  %v52_v12 = vand.u32 127, %v51_v11  ;;  %s407_s1 = smov 32   ;;  %s265_s27 = sshll.u32 %s408_s26, 4  ;;  %s266_s27 = int_to_ptr.vmem [resolvable:$true] %s265_s27 }
  0x2a   :  { %305 = vmatprep.mubr.msk.f32.mxu1 %vm160_vm3, %v149_v5  ;;  %v308_v9 = vpack.c.bf16 %v66_v8, %v65_v7  ;;  %v282_v18 = vld [vmem:[%s505_s4] ss:$0 sm:$0xff]  ;;  %s372_s4 = scalar_lea.vmem %s266_s27, 256  ;;  %p377_p3 = scmp.lt.s32.totalorder %s266_s27, %s266_s27 }
  0x2b   :  { %314 = vmatprep.subr.msk.bf16.mxu1 %vm313_vm2, %v312_v4  ;;  %p373_p2 = scmp.ne.s32.totalorder %s266_s27, %s372_s4  ;;  %p378_p4 = scmp.lt.s32.totalorder %s372_s4, %s372_s4 }
  0x2c   :  { %317 = vmatpush3.bf16.msk.msra.mxu1 %vm313_vm2, %v312_v4  ;;  %57 = vperm.xlu0 %327, %v50_v6  }
  0x2d   :  { %309 = vmatprep.subr.bf16.mxu0 %v308_v9  ;;  %p379_p5 = por %p378_p4, %p377_p3 }
  0x2e   :  { %311 = vmatpush3.bf16.msra.mxu0 %v308_v9 }
  0x2f   :  { %306 = vmatmul.mubr.msk.f32.vlgmr.msra.gmra.mrb[0].mxu1 %vm160_vm3, %v150_v10  ;;  %p380_p6 = pnand %p379_p5, %p373_p2 }
  0xa7   :  { %v55_v13 = vpop.permute.xlu0 %54 }
  0xa8   :  { %vm59_vm5 = vcmp.eq.s32.totalorder %v55_v13, %v52_v12 }
  0xa9   :  { %v278_v15 = vsel %vm59_vm5, 1.0, %v406_v14 }
  0xaa   :  { %298 = vmatprep.mubr.msk.f32.mxu0 %vm67_vm4, %v278_v15 }
  0xab   :  { %v58_v16 = vpop.permute.xlu0 %57 }
  0xac   :  { %vm60_vm6 = vcmp.eq.s32.totalorder %v58_v16, %v52_v12 }
  0xad   :  { %v279_v17 = vsel %vm60_vm6, 1.0, %v406_v14 }
  0xae   :  { %299 = vmatmul.mubr.msk.f32.vlgmr.msra.gmra.mrb[0].mxu0 %vm67_vm4, %v279_v17 }
 0x102   :  { %v307_v19 = vpop.f32.mrb[0].mxu1 }
 0x103   :  { %v237_v20 = vpop.f32.mrb[1].mxu1  ;;  %v243_v22 = vadd.f32 %v307_v19, %v282_v18 }
 0x104   :  { %v238_v21 = vadd.f32 %v282_v18, %v237_v20 }
 0x106   :  { %248 = vrot.lane.b32.xlu1 %v238_v21, %s407_s1 }
 0x10a   :  { %250 = vrot.lane.b32.xlu1 %v243_v22, %s407_s1 }
 0x178   :  { %v249_v23 = vpop.permute.xlu1 %248 }
 0x17c   :  { %v251_v24 = vpop.permute.xlu1 %250 }
 0x181   :  { %v300_v25 = vpop.f32.mrb[0].mxu0 }
 0x182   :  { %v256_v26 = vsel %vm254_vm7, %v300_v25, %v251_v24  ;;  %v140_v27 = vpop.f32.mrb[1].mxu0 }
 0x183   :  { %v255_v28 = vsel %vm254_vm7, %v140_v27, %v249_v23  ;;  %259 = vst.msk [vmem:[#allocation7 + $0x8] sm:$0xff] %vm257_vm8, %v256_v26 }
 0x184   :  { %258 = vst.msk [vmem:[#allocation7] sm:$0xff] %vm257_vm8, %v255_v28 }
 0x185   :  { %383 = shalt.err (!%p380_p6)
}
 0x186   :  { %s384_s7 = scalar_lea.hbm %s506_s5, 256 }
 0x187   :  { %p385_p7 = scmp.ne.s32.totalorder %s506_s5, %s384_s7  ;;  %p388_p8 = scmp.lt.u32.totalorder %s384_s7, %s506_s5 }
 0x189   :  { %p390_p9 = pnand %p388_p8, %p385_p7 }
 0x18b   :  { %393 = shalt.err (!%p390_p9)
}
 0x18c   :  { %271 = dma.vmem_to_hbm [thread:$0]  %s266_s27, 256, %s506_s5, [#allocation4], %s401_s28, %s401_s28, %s402_s29  }
 0x18d   :  { %398 = dma.done.wait [#allocation4], 256  }
 0x18e   :  { %399 = vsyncadd [#allocation4], 4294967040 }
 0x18f   :  { %275 = vsyncpa [#allocation3], 1 }
 0x190   :  { %276 = vsyncpa [#allocation6], 1 }
 0x191   :  { %277 = vsyncpa [#allocation4], 1 }

</bundles_post_ra>
